<compile_context>
chip_gen: v6e
topology: v6e:2x2x1
jax: 0.10.0
libtpu: 0.0.40
codegen_flags: <defaults>
</compile_context>

<pallas_src>
import jax
import jax.numpy as jnp
from jax import lax
from jax.experimental import pallas as pl
from jax.experimental.pallas import tpu as pltpu


def _make_kernel(H, W, Cin, Cmid, No, downsample):
    """No = output lane width: Wo*Cout (downsample) or W*Cout."""
    N1 = W * Cmid
    bf16 = jnp.bfloat16

    def kernel(*refs):
        if downsample:
            (x_ref, w1_ref, b1_ref, w2_ref, bias_ref, wsc_ref, ph_ref,
             o_ref, pad_ref) = refs
        else:
            (x_ref, w1_ref, b1_ref, w2_ref, bias_ref, wsc_ref,
             o_ref, pad_ref) = refs

        x = x_ref[0]                                    # (H+2, W*Cin) f32, H-padded

        # ---- conv1: 3 banded matmuls (kw taps fused), bias folded into the acc init ----
        acc1 = jnp.broadcast_to(b1_ref[...], (H, N1))
        for kh in range(3):
            lhs = x[kh:kh + H, :].astype(bf16)
            acc1 = acc1 + jnp.dot(lhs, w1_ref[kh],
                                  preferred_element_type=jnp.float32)
        h1 = jnp.maximum(acc1, 0.0)                     # (H, W*Cmid) f32

        # ---- row-padded intermediate (lane offset 0). Only border rows need zeroing;
        #      interior is fully overwritten every grid step.
        pad_ref[0:1, :] = jnp.zeros((1, N1), jnp.float32)
        pad_ref[H + 1:H + 2, :] = jnp.zeros((1, N1), jnp.float32)
        pad_ref[1:H + 1, :] = h1

        # ---- conv2 (+ b2) and 1x1 shortcut (+ bsc): both biases folded into acc init,
        #      column pooling (if any) already folded into w2_ref / wsc_ref on the host.
        acc2 = jnp.broadcast_to(bias_ref[...], (H, No))
        for kh in range(3):
            lhs = pad_ref[kh:kh + H, :].astype(bf16)
            acc2 = acc2 + jnp.dot(lhs, w2_ref[kh],
                                  preferred_element_type=jnp.float32)

        x_in = x[1:H + 1, :].astype(bf16)               # un-padded rows
        acc2 = acc2 + jnp.dot(x_in, wsc_ref[...],
                              preferred_element_type=jnp.float32)

        if downsample:
            # remaining avg-pool over rows: one small matmul with the 0.5-valued row-pool matrix
            out = jnp.dot(ph_ref[...], acc2, preferred_element_type=jnp.float32)
        else:
            out = acc2
        o_ref[0] = out.astype(o_ref.dtype)

    return kernel


def _band(w, W):
    """3x3 HWIO conv weight -> per-kh banded matrices (3, W*Ci, W*Co).

    Fuses the 3 kw taps of each kernel row into one band; W-edge taps are truncated
    (equivalent to zero padding along W)."""
    mats = []
    for kh in range(3):
        m = sum(jnp.kron(jnp.eye(W, k=1 - kw, dtype=jnp.float32), w[kh, kw])
                for kw in range(3))
        mats.append(m)
    return jnp.stack(mats)


def optimized_block_forward(x_nchw, params, downsample):
    """Pallas implementation of OptimizedBlock.forward. x_nchw: (B, Cin, H, W)."""
    w1, b1, w2, b2, wsc, bsc = params          # w1/w2: HWIO (3,3,Ci,Co); wsc: (Cin, Cout)
    B, Cin, H, W = x_nchw.shape
    Cmid, Cout = w1.shape[-1], w2.shape[-1]
    Hp = H + 2
    Ho = H // 2 if downsample else H
    Wo = W // 2 if downsample else W
    No = Wo * Cout
    bf16 = jnp.bfloat16

    # ---- activations: NCHW -> row-padded, lane-flattened (B, H+2, W*Cin) ----
    x_nhwc = jnp.transpose(x_nchw, (0, 2, 3, 1)).astype(jnp.float32)
    x_pad = jnp.pad(x_nhwc, ((0, 0), (1, 1), (0, 0), (0, 0)))
    x_l = x_pad.reshape(B, Hp, W * Cin)

    # ---- one-time host-side weight prep: banded kw-fused weights (+ pooling fold) ----
    w1_band = _band(w1, W)                                              # (3, W*Cin,  W*Cmid)
    w2_band = _band(w2, W)                                              # (3, W*Cmid, W*Cout)

    ph = None
    if downsample:
        c = jnp.arange(Wo)
        pcol = (jnp.zeros((Wo, W), jnp.float32)
                .at[c, 2 * c].set(0.5).at[c, 2 * c + 1].set(0.5))       # (Wo, W) column pool
        pwr = jnp.kron(pcol.T, jnp.eye(Cout, dtype=jnp.float32))        # (W*Cout, Wo*Cout)
        w2_fold = jnp.einsum('kab,bc->kac', w2_band, pwr)               # (3, W*Cmid, Wo*Cout)
        wsc_fold = jnp.kron(pcol.T, wsc.astype(jnp.float32))            # (W*Cin, Wo*Cout)
        r = jnp.arange(Ho)
        ph = (jnp.zeros((Ho, H), jnp.float32)
              .at[r, 2 * r].set(0.5).at[r, 2 * r + 1].set(0.5))         # (Ho, H) row pool
    else:
        w2_fold = w2_band                                               # (3, W*Cmid, W*Cout)
        wsc_fold = jnp.kron(jnp.eye(W, dtype=jnp.float32),
                            wsc.astype(jnp.float32))                    # (W*Cin, W*Cout)

    b1_t = jnp.tile(b1, W).astype(jnp.float32)[None, :]                 # (1, W*Cmid)
    bias_t = (jnp.tile(b2, Wo) + jnp.tile(bsc, Wo)).astype(jnp.float32)[None, :]  # (1, No)

    inputs = [x_l,
              w1_band.astype(bf16), b1_t,
              w2_fold.astype(bf16), bias_t,
              wsc_fold.astype(bf16)]
    in_specs = [
        pl.BlockSpec((1, Hp, W * Cin), lambda b: (b, 0, 0)),
        pl.BlockSpec((3, W * Cin, W * Cmid), lambda b: (0, 0, 0)),
        pl.BlockSpec((1, W * Cmid), lambda b: (0, 0)),
        pl.BlockSpec((3, W * Cmid, No), lambda b: (0, 0, 0)),
        pl.BlockSpec((1, No), lambda b: (0, 0)),
        pl.BlockSpec((W * Cin, No), lambda b: (0, 0)),
    ]
    if downsample:
        inputs.append(ph)
        in_specs.append(pl.BlockSpec((Ho, H), lambda b: (0, 0)))

    kernel = _make_kernel(H, W, Cin, Cmid, No, downsample)

    out_l = pl.pallas_call(
        kernel,
        out_shape=jax.ShapeDtypeStruct((B, Ho, No), jnp.float32),
        grid=(B,),
        in_specs=in_specs,
        out_specs=pl.BlockSpec((1, Ho, No), lambda b: (b, 0, 0)),
        scratch_shapes=[pltpu.VMEM((Hp, W * Cmid), jnp.float32)],
        compiler_params=pltpu.CompilerParams(dimension_semantics=("parallel",)),
    )(*inputs)

    # glue: back to NCHW
    return jnp.transpose(out_l.reshape(B, Ho, Wo, Cout), (0, 3, 1, 2))


# ---------------- pure-JAX reference (for correctness check only) ----------------
def _avg_pool2(x):  # NCHW, kernel 2, stride 2
    B, C, H, W = x.shape
    return x.reshape(B, C, H // 2, 2, W // 2, 2).mean(axis=(3, 5))


def ref_forward(x, params, downsample):
    w1, b1, w2, b2, wsc, bsc = params
    dn = ('NCHW', 'HWIO', 'NCHW')
    prec = lax.Precision.HIGHEST
    h = lax.conv_general_dilated(x, w1, (1, 1), 'SAME', dimension_numbers=dn,
                                 precision=prec) + b1[None, :, None, None]
    h = jnp.maximum(h, 0.0)
    h = lax.conv_general_dilated(h, w2, (1, 1), 'SAME', dimension_numbers=dn,
                                 precision=prec) + b2[None, :, None, None]
    if downsample:
        h = _avg_pool2(h)
    s = _avg_pool2(x) if downsample else x
    s = lax.conv_general_dilated(s, wsc[None, None], (1, 1), 'VALID',
                                 dimension_numbers=dn, precision=prec)
    s = s + bsc[None, :, None, None]
    return h + s


if __name__ == "__main__":
    key = jax.random.PRNGKey(0)
    B, Cin, Cout, H, W = 2, 4, 8, 16, 16
    Cmid = Cout
    # NOTE: OptimizedBlock.forward requires learnable_sc (dim_in != dim_out or downsample);
    # Cin != Cout satisfies that for both cases below.

    ks = jax.random.split(key, 7)
    x = jax.random.normal(ks[0], (B, Cin, H, W), jnp.float32)
    w1 = 0.1 * jax.random.normal(ks[1], (3, 3, Cin, Cmid), jnp.float32)   # HWIO
    b1 = 0.1 * jax.random.normal(ks[2], (Cmid,), jnp.float32)
    w2 = 0.1 * jax.random.normal(ks[3], (3, 3, Cmid, Cout), jnp.float32)  # HWIO
    b2 = 0.1 * jax.random.normal(ks[4], (Cout,), jnp.float32)
    wsc = 0.1 * jax.random.normal(ks[5], (Cin, Cout), jnp.float32)        # 1x1 conv (IO)
    bsc = 0.1 * jax.random.normal(ks[6], (Cout,), jnp.float32)
    params = (w1, b1, w2, b2, wsc, bsc)

    ok = True
    for downsample in (True, False):
        out = jax.block_until_ready(optimized_block_forward(x, params, downsample))
        ref = ref_forward(x, params, downsample)
        assert out.shape == ref.shape, (out.shape, ref.shape)
        err = float(jnp.max(jnp.abs(out - ref)))
        # bf16 MXU operands with f32 accumulation vs. f32 reference: loosened tolerance.
        ok = ok and (err < 2.5e-2)

    if ok:
        print("KERNEL_OK")
</pallas_src>

<mosaic_0001>
module attributes {stable_mosaic.version = 11 : i64} {
  func.func @kernel(%arg0: i32, %arg1: memref<1x18x64xf32, #tpu.memory_space<vmem>>, %arg2: memref<3x64x128xbf16, #tpu.memory_space<vmem>>, %arg3: memref<1x128xf32, #tpu.memory_space<vmem>>, %arg4: memref<3x128x64xbf16, #tpu.memory_space<vmem>>, %arg5: memref<1x64xf32, #tpu.memory_space<vmem>>, %arg6: memref<64x64xbf16, #tpu.memory_space<vmem>>, %arg7: memref<8x16xf32, #tpu.memory_space<vmem>>, %arg8: memref<1x8x64xf32, #tpu.memory_space<vmem>>, %arg9: memref<18x128xf32, #tpu.memory_space<vmem>>) attributes {dimension_semantics = [#tpu.dimension_semantics<parallel>], iteration_bounds = array<i64: 2>, scalar_prefetch = 0 : i64, scratch_operands = 1 : i64, tpu.core_type = #tpu.core_type<tc>, window_params = [{transform_indices = @transform_0, window_bounds = array<i64: 1, 18, 64>}, {pipeline_mode = #tpu.pipeline_mode<synchronous>, transform_indices = @transform_1, window_bounds = array<i64: 3, 64, 128>}, {pipeline_mode = #tpu.pipeline_mode<synchronous>, transform_indices = @transform_2, window_bounds = array<i64: 1, 128>}, {pipeline_mode = #tpu.pipeline_mode<synchronous>, transform_indices = @transform_3, window_bounds = array<i64: 3, 128, 64>}, {pipeline_mode = #tpu.pipeline_mode<synchronous>, transform_indices = @transform_4, window_bounds = array<i64: 1, 64>}, {pipeline_mode = #tpu.pipeline_mode<synchronous>, transform_indices = @transform_5, window_bounds = array<i64: 64, 64>}, {pipeline_mode = #tpu.pipeline_mode<synchronous>, transform_indices = @transform_6, window_bounds = array<i64: 8, 16>}, {transform_indices = @transform_7, window_bounds = array<i64: 1, 8, 64>}]} {
    %c0 = arith.constant 0 : index
    %c0_0 = arith.constant 0 : index
    %c0_1 = arith.constant 0 : index
    %0 = vector.load %arg1[%c0, %c0_0, %c0_1] : memref<1x18x64xf32, #tpu.memory_space<vmem>>, vector<1x18x64xf32>
    %1 = vector.shape_cast %0 : vector<1x18x64xf32> to vector<18x64xf32>
    %c0_2 = arith.constant 0 : index
    %c0_3 = arith.constant 0 : index
    %2 = vector.load %arg3[%c0_2, %c0_3] : memref<1x128xf32, #tpu.memory_space<vmem>>, vector<1x128xf32>
    %3 = vector.shape_cast %2 : vector<1x128xf32> to vector<1x128xf32>
    %4 = vector.broadcast %3 : vector<1x128xf32> to vector<16x128xf32>
    %5 = vector.extract_strided_slice %1 {offsets = [0, 0], sizes = [16, 64], strides = [1, 1]} : vector<18x64xf32> to vector<16x64xf32>
    %6 = arith.truncf %5 : vector<16x64xf32> to vector<16x64xbf16>
    %c0_4 = arith.constant 0 : index
    %c0_5 = arith.constant 0 : index
    %c0_6 = arith.constant 0 : index
    %7 = vector.load %arg2[%c0_4, %c0_5, %c0_6] : memref<3x64x128xbf16, #tpu.memory_space<vmem>>, vector<1x64x128xbf16>
    %8 = vector.shape_cast %7 : vector<1x64x128xbf16> to vector<64x128xbf16>
    %cst = arith.constant dense<0.000000e+00> : vector<16x128xf32>
    %9 = tpu.matmul %6, %8, %cst {dimension_numbers = #tpu.dot_dimension_numbers<[1], [0], [0], [1], [0, 0, 1, 1], [], []>} : vector<16x64xbf16>, vector<64x128xbf16>, vector<16x128xf32> -> vector<16x128xf32>
    %10 = arith.addf %4, %9 : vector<16x128xf32>
    %11 = vector.extract_strided_slice %1 {offsets = [1, 0], sizes = [16, 64], strides = [1, 1]} : vector<18x64xf32> to vector<16x64xf32>
    %12 = arith.truncf %11 : vector<16x64xf32> to vector<16x64xbf16>
    %c1 = arith.constant 1 : index
    %c0_7 = arith.constant 0 : index
    %c0_8 = arith.constant 0 : index
    %13 = vector.load %arg2[%c1, %c0_7, %c0_8] : memref<3x64x128xbf16, #tpu.memory_space<vmem>>, vector<1x64x128xbf16>
    %14 = vector.shape_cast %13 : vector<1x64x128xbf16> to vector<64x128xbf16>
    %cst_9 = arith.constant dense<0.000000e+00> : vector<16x128xf32>
    %15 = tpu.matmul %12, %14, %cst_9 {dimension_numbers = #tpu.dot_dimension_numbers<[1], [0], [0], [1], [0, 0, 1, 1], [], []>} : vector<16x64xbf16>, vector<64x128xbf16>, vector<16x128xf32> -> vector<16x128xf32>
    %16 = arith.addf %10, %15 : vector<16x128xf32>
    %17 = vector.extract_strided_slice %1 {offsets = [2, 0], sizes = [16, 64], strides = [1, 1]} : vector<18x64xf32> to vector<16x64xf32>
    %18 = arith.truncf %17 : vector<16x64xf32> to vector<16x64xbf16>
    %c2 = arith.constant 2 : index
    %c0_10 = arith.constant 0 : index
    %c0_11 = arith.constant 0 : index
    %19 = vector.load %arg2[%c2, %c0_10, %c0_11] : memref<3x64x128xbf16, #tpu.memory_space<vmem>>, vector<1x64x128xbf16>
    %20 = vector.shape_cast %19 : vector<1x64x128xbf16> to vector<64x128xbf16>
    %cst_12 = arith.constant dense<0.000000e+00> : vector<16x128xf32>
    %21 = tpu.matmul %18, %20, %cst_12 {dimension_numbers = #tpu.dot_dimension_numbers<[1], [0], [0], [1], [0, 0, 1, 1], [], []>} : vector<16x64xbf16>, vector<64x128xbf16>, vector<16x128xf32> -> vector<16x128xf32>
    %22 = arith.addf %16, %21 : vector<16x128xf32>
    %cst_13 = arith.constant 0.000000e+00 : f32
    %23 = vector.broadcast %cst_13 : f32 to vector<16x128xf32>
    %24 = arith.maximumf %22, %23 : vector<16x128xf32>
    %cst_14 = arith.constant 0.000000e+00 : f32
    %25 = vector.broadcast %cst_14 : f32 to vector<1x128xf32>
    %c0_15 = arith.constant 0 : index
    %c0_16 = arith.constant 0 : index
    %26 = vector.load %arg9[%c0_15, %c0_16] : memref<18x128xf32, #tpu.memory_space<vmem>>, vector<1x128xf32>
    tpu.vector_store %arg9[%c0_15, %c0_16], %25 {strides = array<i32>} : memref<18x128xf32, #tpu.memory_space<vmem>>, vector<1x128xf32>,
    %cst_17 = arith.constant 0.000000e+00 : f32
    %27 = vector.broadcast %cst_17 : f32 to vector<1x128xf32>
    %c17 = arith.constant 17 : index
    %c0_18 = arith.constant 0 : index
    %28 = vector.load %arg9[%c17, %c0_18] : memref<18x128xf32, #tpu.memory_space<vmem>>, vector<1x128xf32>
    tpu.vector_store %arg9[%c17, %c0_18], %27 {strides = array<i32>} : memref<18x128xf32, #tpu.memory_space<vmem>>, vector<1x128xf32>,
    %c1_19 = arith.constant 1 : index
    %c0_20 = arith.constant 0 : index
    %29 = vector.load %arg9[%c1_19, %c0_20] : memref<18x128xf32, #tpu.memory_space<vmem>>, vector<16x128xf32>
    tpu.vector_store %arg9[%c1_19, %c0_20], %24 {strides = array<i32>} : memref<18x128xf32, #tpu.memory_space<vmem>>, vector<16x128xf32>,
    %c0_21 = arith.constant 0 : index
    %c0_22 = arith.constant 0 : index
    %30 = vector.load %arg5[%c0_21, %c0_22] : memref<1x64xf32, #tpu.memory_space<vmem>>, vector<1x64xf32>
    %31 = vector.shape_cast %30 : vector<1x64xf32> to vector<1x64xf32>
    %32 = vector.broadcast %31 : vector<1x64xf32> to vector<16x64xf32>
    %c0_23 = arith.constant 0 : index
    %c0_24 = arith.constant 0 : index
    %33 = vector.load %arg9[%c0_23, %c0_24] : memref<18x128xf32, #tpu.memory_space<vmem>>, vector<16x128xf32>
    %34 = arith.truncf %33 : vector<16x128xf32> to vector<16x128xbf16>
    %c0_25 = arith.constant 0 : index
    %c0_26 = arith.constant 0 : index
    %c0_27 = arith.constant 0 : index
    %35 = vector.load %arg4[%c0_25, %c0_26, %c0_27] : memref<3x128x64xbf16, #tpu.memory_space<vmem>>, vector<1x128x64xbf16>
    %36 = vector.shape_cast %35 : vector<1x128x64xbf16> to vector<128x64xbf16>
    %cst_28 = arith.constant dense<0.000000e+00> : vector<16x64xf32>
    %37 = tpu.matmul %34, %36, %cst_28 {dimension_numbers = #tpu.dot_dimension_numbers<[1], [0], [0], [1], [0, 0, 1, 1], [], []>} : vector<16x128xbf16>, vector<128x64xbf16>, vector<16x64xf32> -> vector<16x64xf32>
    %38 = arith.addf %32, %37 : vector<16x64xf32>
    %c1_29 = arith.constant 1 : index
    %c0_30 = arith.constant 0 : index
    %39 = vector.load %arg9[%c1_29, %c0_30] : memref<18x128xf32, #tpu.memory_space<vmem>>, vector<16x128xf32>
    %40 = arith.truncf %39 : vector<16x128xf32> to vector<16x128xbf16>
    %c1_31 = arith.constant 1 : index
    %c0_32 = arith.constant 0 : index
    %c0_33 = arith.constant 0 : index
    %41 = vector.load %arg4[%c1_31, %c0_32, %c0_33] : memref<3x128x64xbf16, #tpu.memory_space<vmem>>, vector<1x128x64xbf16>
    %42 = vector.shape_cast %41 : vector<1x128x64xbf16> to vector<128x64xbf16>
    %cst_34 = arith.constant dense<0.000000e+00> : vector<16x64xf32>
    %43 = tpu.matmul %40, %42, %cst_34 {dimension_numbers = #tpu.dot_dimension_numbers<[1], [0], [0], [1], [0, 0, 1, 1], [], []>} : vector<16x128xbf16>, vector<128x64xbf16>, vector<16x64xf32> -> vector<16x64xf32>
    %44 = arith.addf %38, %43 : vector<16x64xf32>
    %c2_35 = arith.constant 2 : index
    %c0_36 = arith.constant 0 : index
    %45 = vector.load %arg9[%c2_35, %c0_36] : memref<18x128xf32, #tpu.memory_space<vmem>>, vector<16x128xf32>
    %46 = arith.truncf %45 : vector<16x128xf32> to vector<16x128xbf16>
    %c2_37 = arith.constant 2 : index
    %c0_38 = arith.constant 0 : index
    %c0_39 = arith.constant 0 : index
    %47 = vector.load %arg4[%c2_37, %c0_38, %c0_39] : memref<3x128x64xbf16, #tpu.memory_space<vmem>>, vector<1x128x64xbf16>
    %48 = vector.shape_cast %47 : vector<1x128x64xbf16> to vector<128x64xbf16>
    %cst_40 = arith.constant dense<0.000000e+00> : vector<16x64xf32>
    %49 = tpu.matmul %46, %48, %cst_40 {dimension_numbers = #tpu.dot_dimension_numbers<[1], [0], [0], [1], [0, 0, 1, 1], [], []>} : vector<16x128xbf16>, vector<128x64xbf16>, vector<16x64xf32> -> vector<16x64xf32>
    %50 = arith.addf %44, %49 : vector<16x64xf32>
    %51 = vector.extract_strided_slice %1 {offsets = [1, 0], sizes = [16, 64], strides = [1, 1]} : vector<18x64xf32> to vector<16x64xf32>
    %52 = arith.truncf %51 : vector<16x64xf32> to vector<16x64xbf16>
    %c0_41 = arith.constant 0 : index
    %c0_42 = arith.constant 0 : index
    %53 = vector.load %arg6[%c0_41, %c0_42] : memref<64x64xbf16, #tpu.memory_space<vmem>>, vector<64x64xbf16>
    %cst_43 = arith.constant dense<0.000000e+00> : vector<16x64xf32>
    %54 = tpu.matmul %52, %53, %cst_43 {dimension_numbers = #tpu.dot_dimension_numbers<[1], [0], [0], [1], [0, 0, 1, 1], [], []>} : vector<16x64xbf16>, vector<64x64xbf16>, vector<16x64xf32> -> vector<16x64xf32>
    %55 = arith.addf %50, %54 : vector<16x64xf32>
    %c0_44 = arith.constant 0 : index
    %c0_45 = arith.constant 0 : index
    %56 = vector.load %arg7[%c0_44, %c0_45] : memref<8x16xf32, #tpu.memory_space<vmem>>, vector<8x16xf32>
    %cst_46 = arith.constant dense<0.000000e+00> : vector<8x64xf32>
    %57 = tpu.matmul %56, %55, %cst_46 {dimension_numbers = #tpu.dot_dimension_numbers<[1], [0], [0], [1], [0, 0, 1, 1], [], []>} : vector<8x16xf32>, vector<16x64xf32>, vector<8x64xf32> -> vector<8x64xf32>
    %c0_47 = arith.constant 0 : index
    %c0_48 = arith.constant 0 : index
    %c0_49 = arith.constant 0 : index
    %58 = vector.load %arg8[%c0_47, %c0_48, %c0_49] : memref<1x8x64xf32, #tpu.memory_space<vmem>>, vector<1x8x64xf32>
    %59 = vector.shape_cast %58 : vector<1x8x64xf32> to vector<8x64xf32>
    %60 = vector.shape_cast %57 : vector<8x64xf32> to vector<1x8x64xf32>
    tpu.vector_store %arg8[%c0_47, %c0_48, %c0_49], %60 {strides = array<i32>} : memref<1x8x64xf32, #tpu.memory_space<vmem>>, vector<1x8x64xf32>,
    return
  }
  func.func @transform_0(%arg0: i32) -> (i32, i32, i32) {
    %c0_i32 = arith.constant 0 : i32
    %c0_i32_0 = arith.constant 0 : i32
    %c0_i32_1 = arith.constant 0 : i32
    return %arg0, %c0_i32, %c0_i32_0 : i32, i32, i32
  }
  func.func @transform_1(%arg0: i32) -> (i32, i32, i32) {
    %c0_i32 = arith.constant 0 : i32
    %c0_i32_0 = arith.constant 0 : i32
    %c0_i32_1 = arith.constant 0 : i32
    %c0_i32_2 = arith.constant 0 : i32
    return %c0_i32, %c0_i32_0, %c0_i32_1 : i32, i32, i32
  }
  func.func @transform_2(%arg0: i32) -> (i32, i32) {
    %c0_i32 = arith.constant 0 : i32
    %c0_i32_0 = arith.constant 0 : i32
    %c0_i32_1 = arith.constant 0 : i32
    return %c0_i32, %c0_i32_0 : i32, i32
  }
  func.func @transform_3(%arg0: i32) -> (i32, i32, i32) {
    %c0_i32 = arith.constant 0 : i32
    %c0_i32_0 = arith.constant 0 : i32
    %c0_i32_1 = arith.constant 0 : i32
    %c0_i32_2 = arith.constant 0 : i32
    return %c0_i32, %c0_i32_0, %c0_i32_1 : i32, i32, i32
  }
  func.func @transform_4(%arg0: i32) -> (i32, i32) {
    %c0_i32 = arith.constant 0 : i32
    %c0_i32_0 = arith.constant 0 : i32
    %c0_i32_1 = arith.constant 0 : i32
    return %c0_i32, %c0_i32_0 : i32, i32
  }
  func.func @transform_5(%arg0: i32) -> (i32, i32) {
    %c0_i32 = arith.constant 0 : i32
    %c0_i32_0 = arith.constant 0 : i32
    %c0_i32_1 = arith.constant 0 : i32
    return %c0_i32, %c0_i32_0 : i32, i32
  }
  func.func @transform_6(%arg0: i32) -> (i32, i32) {
    %c0_i32 = arith.constant 0 : i32
    %c0_i32_0 = arith.constant 0 : i32
    %c0_i32_1 = arith.constant 0 : i32
    return %c0_i32, %c0_i32_0 : i32, i32
  }
  func.func @transform_7(%arg0: i32) -> (i32, i32, i32) {
    %c0_i32 = arith.constant 0 : i32
    %c0_i32_0 = arith.constant 0 : i32
    %c0_i32_1 = arith.constant 0 : i32
    return %arg0, %c0_i32, %c0_i32_0 : i32, i32, i32
  }
}

</mosaic_0001>

<bundles_post_ra>
// kernel: tpu_custom_call.1
= control target key start
LH: loop header
LB: loop body
LE: loop exit
PB: predicated region body
PF: predicated region fallthrough
CT: control target
= control target key end

     0   :  { %12 = vsyncpa [#allocation4], 0  ;;  %s1868_s0 = inlined_call_operand.vmem [shape: f32[2,18,64], index: 0, kind: input, shape index: {}]   ;;  %s1869_s1 = inlined_call_operand.vmem [shape: bf16[3,64,128], index: 1, kind: input, shape index: {}]   ;;  %s1870_s2 = inlined_call_operand.vmem [shape: f32[1,128], index: 2, kind: input, shape index: {}]   ;;  %s1871_s3 = inlined_call_operand.vmem [shape: bf16[3,128,64], index: 3, kind: input, shape index: {}]   ;;  %s1872_s4 = inlined_call_operand.vmem [shape: f32[1,64], index: 4, kind: input, shape index: {}]   ;;  %s1873_s5 = inlined_call_operand.vmem [shape: bf16[64,64], index: 5, kind: input, shape index: {}]   ;;  %s1874_s6 = inlined_call_operand.vmem [shape: f32[8,16], index: 6, kind: input, shape index: {}]   ;;  %s1875_s7 = inlined_call_operand.hbm [shape: f32[2,8,64], index: 7, kind: output, shape index: {}]  }
   0x1   :  { %14 = vsyncpa [#allocation4 + $0x1], 0  ;;  %s1571_s24 = smov 0   ;;  %s1573_s25 = smov 0  }
   0x2   :  { %s1575_s26 = smov 0   ;;  %s1577_s27 = smov 0  }
   0x3 LB: > { %s1592_s28 = sadd.s32 4294967295, %s1526_s27   ;;  %s1114_s29 = sadd.s32 4294967294, %s1526_s27   ;;  %s1526_s27 = sphi %s1577_s27, %s1881_s27   ;;  %s1522_s26 = sphi %s1575_s26, %s1880_s26   ;;  %s1518_s25 = sphi %s1573_s25, %s1879_s25   ;;  %s1514_s24 = sphi %s1571_s24, %s1878_s24  }
   0x4   : > { %s1596_s30 = sadd.s32 1, %s1526_s27   ;;  %s179_s8 = sadd.s32 1, %s1522_s26 }
   0x5   : > { %s176_s9 = ssub.s32 %s1526_s27, %s1596_s30  ;;  %p189_p0 = scmp.ne.s32.totalorder %s1522_s26, %s1518_s25 }
   0x6   : > { %p177_p1 = scmp.eq.s32.totalorder %s176_s9, 0  ;;  %p190_p2 = scmp.eq.s32.totalorder %s1592_s28, 1 }
   0x7   : > { %p195_p3 = scmp.ne.s32.totalorder %s1518_s25, %s1514_s24  ;;  %p196_p4 = scmp.eq.s32.totalorder %s1114_s29, 1 }
   0x8   : > { %s1607_s10 = scalar_select %p177_p1, %s1522_s26, %s179_s8  }
   0x9   : > { %p1609_p5 = por %p190_p2, %p189_p0  ;;  %p1613_p6 = por %p196_p4, %p195_p3 }
   0xa   : > { %p1117_p7 = scmp.ge.s32.totalorder %s1526_s27, 1  ;;  %p240_p8 = scmp.lt.s32.totalorder %s1526_s27, 3 }
   0xc   : > { %p241_p9 = pnand %p1117_p7, %p240_p8 }
   0xd   : > { %p272_p10 = scmp.lt.s32.totalorder (!%p241_p9), %s1592_s28, 1  ;;  %s269_s20 = sand.u32 (!%p241_p9), 1, %s1518_s25  }
   0xe   : > { %244 = sbr.rel (%p241_p9) target bundleno = 706 (0x2c2), region = 48  ;;  %s1216_s22 = sshll.u32 (!%p241_p9), %s1592_s28, 7 }
   0xf   : > { %s1826_s13 = scalar_lea.hbm (!%p241_p9), %s1875_s7, %s1216_s22  ;;  %s1042_s14 = scalar_lea.sflag (!%p241_p9), [#allocation4], %s269_s20 }
  0x13   : > { %v1426_v0 = vld [vmem:[%s1869_s1 + $0x18] sm:$0xff]   ;;  %v1528_v1 = vmov 0.0   ;;  %v1428_v3 = vld [vmem:[%s1869_s1 + $0x10] sm:$0xff]   ;;  %vm1529_vm0 = vmmov 0   ;;  %s273_s21 = scalar_select %p272_p10, %s1592_s28, 1  ;;  %v1430_v5 = vld [vmem:[%s1869_s1 + $0x8] sm:$0xff]  }
  0x14   : > { %1269 = vmatprep.subr.bf16.mxu0 %v1528_v1  ;;  %547 = vst [vmem:[#allocation2] sm:$0x1] %v1528_v1  ;;  %548 = vst [vmem:[#allocation2 + $0x11] sm:$0x1] %v1528_v1  ;;  %1281 = vmatprep.subr.bf16.mxu1 %v1528_v1  ;;  %v1427_v2 = vld [vmem:[%s1869_s1 + $0x38] sm:$0xff]   ;;  %v1429_v4 = vld [vmem:[%s1869_s1 + $0x30] sm:$0xff]  }
  0x15   : > { %1270 = vmatpush3.bf16.msra.mxu0 %v1426_v0  ;;  %1277 = vmatprep.mubr.msk.bf16.mxu0 %vm1529_vm0, %v1528_v1  ;;  %s1384_s29 = smul.u32 24, %s273_s21  ;;  %v1431_v6 = vld [vmem:[%s1869_s1 + $0x28] sm:$0xff]   ;;  %v1432_v10 = vld [vmem:[%s1869_s1] sm:$0xff]   ;;  %vm321_vm1 = vcmask 523264   ;;  %v1434_v14 = vld [vmem:[%s1869_s1 + $0x58] sm:$0xff]   ;;  %vm471_vm3 = vcmask 1046528  }
  0x16   : > { %1282 = vmatpush3.bf16.msra.mxu1 %v1427_v2  ;;  %1271 = vmatprep.subr.bf16.mxu0 %v1528_v1  ;;  %v1433_v13 = vld [vmem:[%s1869_s1 + $0x20] sm:$0xff]   ;;  %vm378_vm2 = vsmask.f32 7424  ;;  %v1435_v23 = vld [vmem:[%s1869_s1 + $0x50] sm:$0xff]   ;;  %v1436_v25 = vld [vmem:[%s1869_s1 + $0x48] sm:$0xff]   ;;  %vm966_vm4 = vcmask 130048  }
  0x17   : > { %1283 = vmatprep.subr.bf16.mxu1 %v1528_v1  ;;  %1289 = vmatprep.mubr.msk.bf16.mxu1 %vm1529_vm0, %v1528_v1  ;;  %s276_s15 = scalar_lea.vmem %s1868_s0, %s1384_s29  ;;  %v1437_v26 = vld [vmem:[%s1869_s1 + $0x40] sm:$0xff]   ;;  %v1439_v28 = vld [vmem:[%s1871_s3 + $0x78] sm:$0xff]   ;;  %v1441_v29 = vld [vmem:[%s1871_s3 + $0x70] sm:$0xff]   ;;  %s1118_s21 = sshll.u32 %s269_s20, 3 }
  0x18   : > { %v278_v7 = vld [vmem:[%s276_s15] sm:$0xff]  ;;  %v279_v8 = vld [vmem:[%s276_s15 + $0x8] sm:$0xff]  ;;  %v280_v9 = vld [vmem:[%s276_s15 + $0x10] sm:$0x3]  ;;  %s271_s23 = scalar_lea.vmem [#allocation3], %s1118_s21  ;;  %s1530_s28 = smov [#allocation3]  }
  0x19   : > { %1272 = vmatpush3.bf16.msra.mxu0 %v1428_v3  ;;  %v288_v11 = vpack.c.bf16 %v279_v8, %v278_v7  ;;  %v368_v12 = vpack.c.bf16 %v280_v9, %v280_v9  ;;  %v1438_v30 = vld [vmem:[%s1871_s3 + $0x38] sm:$0xff]   ;;  %v1443_v31 = vld [vmem:[%s1871_s3 + $0x68] sm:$0xff]   ;;  %v1440_v32 = vld [vmem:[%s1871_s3 + $0x30] sm:$0xff]   ;;  %s1055_s29 = sshll.u32 %s271_s23, 4  ;;  %s1470_s16 = sshll.u32 %s1530_s28, 4  ;;  %s1828_s29 = int_to_ptr.vmem [resolvable:$true] %s1055_s29  ;;  %s1471_s16 = int_to_ptr.vmem [resolvable:$false] %s1470_s16 }
  0x1a   : > { %1284 = vmatpush3.bf16.msra.mxu1 %v1429_v4  ;;  %1273 = vmatprep.subr.bf16.mxu0 %v1528_v1  ;;  %v1445_v33 = vld [vmem:[%s1871_s3 + $0x60] sm:$0xff]   ;;  %v1442_v34 = vld [vmem:[%s1871_s3 + $0x28] sm:$0xff]   ;;  %v1447_v35 = vld [vmem:[%s1871_s3 + $0x58] sm:$0xff]   ;;  %s1466_s15 = scalar_lea.vmem %s1828_s29, 128  ;;  %s1472_s17 = scalar_lea.vmem %s1471_s16, 256 }
  0x1b   : > { %1285 = vmatprep.subr.bf16.mxu1 %v1528_v1  ;;  %v379_v15 = vshrl.u32 %v288_v11, 16  ;;  %v381_v16 = vshll.u32 %v288_v11, 16  ;;  %v386_v17 = vshll.u32 %v368_v12, 16  ;;  %v472_v18 = vrot.slane %v288_v11, 1  ;;  %v1444_v36 = vld [vmem:[%s1871_s3 + $0x20] sm:$0xff]   ;;  %v1449_v37 = vld [vmem:[%s1871_s3 + $0x50] sm:$0xff]   ;;  %p1467_p11 = scmp.ne.s32.totalorder %s1828_s29, %s1466_s15  ;;  %p1473_p0 = scmp.lt.s32.totalorder %s1828_s29, %s1471_s16 }
  0x1c   : > { %v473_v19 = vrot.slane %v368_v12, 1  ;;  %v1446_v38 = vld [vmem:[%s1871_s3 + $0x18] sm:$0xff]   ;;  %v1451_v39 = vld [vmem:[%s1871_s3 + $0x48] sm:$0xff]   ;;  %v1448_v40 = vld [vmem:[%s1871_s3 + $0x10] sm:$0xff]   ;;  %p1474_p1 = scmp.lt.s32.totalorder %s1472_s17, %s1466_s15 }
  0x1d   : > { %1274 = vmatpush3.bf16.msra.mxu0 %v1430_v5  ;;  %v383_v20 = vrot.slane %v381_v16, 1  ;;  %v388_v21 = vrot.slane %v386_v17, 1  ;;  %v1453_v41 = vld [vmem:[%s1871_s3 + $0x40] sm:$0xff]   ;;  %v1450_v42 = vld [vmem:[%s1871_s3 + $0x8] sm:$0xff]   ;;  %v1458_v2 = vld [vmem:[%s1873_s5 + $0x18] sm:$0xff]   ;;  %p1468_p12 = pnand %p1467_p11, %p1609_p5 }
  0x1e   : > { %1286 = vmatpush3.bf16.msra.mxu1 %v1431_v6  ;;  %1275 = vmatprep.subr.bf16.mxu0 %v1528_v1  ;;  %v474_v27 = vsel %vm471_vm3, %v472_v18, %v473_v19  ;;  %v1452_v43 = vld [vmem:[%s1871_s3] sm:$0xff]   ;;  %v1460_v4 = vld [vmem:[%s1873_s5 + $0x10] sm:$0xff]   ;;  %v1454_v5 = vld [vmem:[%s1871_s3 + $0xb8] sm:$0xff]   ;;  %p1475_p2 = por %p1474_p1, %p1473_p0 }
  0x1f   : > { %1287 = vmatprep.subr.bf16.mxu1 %v1528_v1  ;;  %v384_v22 = vor.u32 %v383_v20, %v379_v15  ;;  %v1120_v51 = vld [vmem:[%s1870_s2] ss:$0 sm:$0xff]  ;;  %v1462_v8 = vld [vmem:[%s1873_s5 + $0x8] sm:$0xff]   ;;  %v1461_v15 = vld [vmem:[%s1871_s3 + $0x90] sm:$0xff]   ;;  %p1469_p13 = pneg %p1468_p12 }
  0x20   : > { %v1456_v12 = vld [vmem:[%s1871_s3 + $0xa8] sm:$0xff]   ;;  %v1465_v17 = vld [vmem:[%s1871_s3 + $0x80] sm:$0xff]  }
  0x21   : > { %1276 = vmatpush3.bf16.msra.mxu0 %v1432_v10  ;;  %v1671_v24 = vsel %vm378_vm2, %v384_v22, %v388_v21  ;;  %v1455_v10 = vld [vmem:[%s1871_s3 + $0xb0] sm:$0xff]   ;;  %v1463_v16 = vld [vmem:[%s1871_s3 + $0x88] sm:$0xff]   ;;  %p1476_p3 = pnand %p1475_p2, %p1469_p13 }
  0x22   : > { %1288 = vmatpush3.bf16.msra.mxu1 %v1433_v13  ;;  %1293 = vmatprep.subr.bf16.mxu0 %v1528_v1  ;;  %v1457_v13 = vld [vmem:[%s1871_s3 + $0xa0] sm:$0xff]  }
  0x23   : > { %1305 = vmatprep.subr.bf16.mxu1 %v1528_v1 }
  0x24   : > { %1278 = vmatmul.mubr.msk.bf16.vlgmr.msra.gmra.mxu0 %vm321_vm1, %v288_v11  ;;  %v1464_v11 = vld [vmem:[%s1873_s5] sm:$0xff]  }
  0x25   : > { %1294 = vmatpush3.bf16.msra.mxu0 %v1434_v14  ;;  %1301 = vmatprep.mubr.msk.bf16.mxu0 %vm1529_vm0, %v1528_v1  ;;  %v1459_v14 = vld [vmem:[%s1871_s3 + $0x98] sm:$0xff]  }
  0x26   : > { %1290 = vmatmul.mubr.msk.bf16.vlgmr.msra.gmra.mxu1 %vm321_vm1, %v1671_v24  ;;  %1295 = vmatprep.subr.bf16.mxu0 %v1528_v1 }
  0x27   : > { %1321 = vmatprep.mubr.msk.bf16.mxu1 %vm1529_vm0, %v1528_v1  ;;  %1306 = vmatpush3.bf16.msra.mxu1 %v1438_v30 }
  0x28   : > { %1307 = vmatprep.subr.bf16.mxu1 %v1528_v1 }
  0x29   : > { %1296 = vmatpush3.bf16.msra.mxu0 %v1435_v23 }
  0x2a   : > { %1297 = vmatprep.subr.bf16.mxu0 %v1528_v1 }
  0x2b   : > { %1308 = vmatpush3.bf16.msra.mxu1 %v1440_v32 }
  0x2c   : > { %1309 = vmatprep.subr.bf16.mxu1 %v1528_v1 }
  0x2d   : > { %1298 = vmatpush3.bf16.msra.mxu0 %v1436_v25 }
  0x2e   : > { %1299 = vmatprep.subr.bf16.mxu0 %v1528_v1 }
  0x2f   : > { %1310 = vmatpush3.bf16.msra.mxu1 %v1442_v34 }
  0x30   : > { %1311 = vmatprep.subr.bf16.mxu1 %v1528_v1 }
  0x31   : > { %1300 = vmatpush3.bf16.msra.mxu0 %v1437_v26 }
  0x32   : > { %1325 = vmatprep.subr.bf16.mxu0 %v1528_v1 }
  0x33   : > { %1312 = vmatpush3.bf16.msra.mxu1 %v1444_v36 }
  0x34   : > { %1302 = vmatmul.mubr.msk.bf16.vlgmr.msra.gmra.mxu0 %vm321_vm1, %v474_v27  ;;  %1313 = vmatprep.subr.bf16.mxu1 %v1528_v1 }
  0x35   : > { %1341 = vmatprep.mubr.msk.bf16.mxu0 %vm1529_vm0, %v1528_v1  ;;  %1326 = vmatpush3.bf16.msra.mxu0 %v1439_v28 }
  0x36   : > { %1327 = vmatprep.subr.bf16.mxu0 %v1528_v1 }
  0x37   : > { %1314 = vmatpush3.bf16.msra.mxu1 %v1446_v38 }
  0x38   : > { %1315 = vmatprep.subr.bf16.mxu1 %v1528_v1 }
  0x39   : > { %1328 = vmatpush3.bf16.msra.mxu0 %v1441_v29 }
  0x3a   : > { %1329 = vmatprep.subr.bf16.mxu0 %v1528_v1 }
  0x3b   : > { %1316 = vmatpush3.bf16.msra.mxu1 %v1448_v40 }
  0x3c   : > { %1317 = vmatprep.subr.bf16.mxu1 %v1528_v1 }
  0x3d   : > { %1330 = vmatpush3.bf16.msra.mxu0 %v1443_v31 }
  0x3e   : > { %1331 = vmatprep.subr.bf16.mxu0 %v1528_v1 }
  0x3f   : > { %1318 = vmatpush3.bf16.msra.mxu1 %v1450_v42 }
  0x40   : > { %1319 = vmatprep.subr.bf16.mxu1 %v1528_v1 }
  0x41   : > { %1332 = vmatpush3.bf16.msra.mxu0 %v1445_v33  ;;  %v1152_v33 = vld [vmem:[%s1872_s4] ss:$0 sm:$0xff] }
  0x42   : > { %1333 = vmatprep.subr.bf16.mxu0 %v1528_v1 }
  0x43   : > { %1320 = vmatpush3.bf16.msra.mxu1 %v1452_v43 }
  0x44   : > { %1345 = vmatprep.subr.bf16.mxu1 %v1528_v1 }
  0x45   : > { %1334 = vmatpush3.bf16.msra.mxu0 %v1447_v35 }
  0x46   : > { %1335 = vmatprep.subr.bf16.mxu0 %v1528_v1 }
  0x49   : > { %1336 = vmatpush3.bf16.msra.mxu0 %v1449_v37 }
  0x4a   : > { %1337 = vmatprep.subr.bf16.mxu0 %v1528_v1 }
  0x4d   : > { %1338 = vmatpush3.bf16.msra.mxu0 %v1451_v39 }
  0x4e   : > { %1339 = vmatprep.subr.bf16.mxu0 %v1528_v1 }
  0x51   : > { %1340 = vmatpush3.bf16.msra.mxu0 %v1453_v41 }
  0x52   : > { %1365 = vmatprep.subr.bf16.mxu0 %v1528_v1 }
  0xe4   : > { %v359_v44 = vpop.f32.mrf.mxu0 }
  0xe5   : > { %v366_v53 = vadd.f32 %v1120_v51, %v359_v44 }
  0xe6   : > { %v1279_v45 = vpop.f32.mrf.mxu0  ;;  %v451_v46 = vpop.f32.mrf.mxu1 }
  0xe7   : > { %v458_v54 = vadd.f32 %v451_v46, %v366_v53  ;;  %v965_v46 = vld [vmem:[%s1874_s6] sm:$0xff] }
  0xe8   : > { %v362_v47 = vpop.f32.mrf.mxu0  ;;  %v1291_v48 = vpop.f32.mrf.mxu1 }
  0xe9   : > { %v367_v55 = vadd.f32 %v1120_v51, %v362_v47 }
  0xea   : > { %v1280_v49 = vpop.f32.mrf.mxu0  ;;  %v454_v50 = vpop.f32.mrf.mxu1 }
  0xeb   : > { %v459_v59 = vadd.f32 %v454_v50, %v367_v55 }
  0xec   : > { %v1292_v52 = vpop.f32.mrf.mxu1 }
  0xf4   : > { %v536_v56 = vpop.f32.mrf.mxu0 }
  0xf5   : > { %v543_v57 = vadd.f32 %v536_v56, %v458_v54 }
  0xf6   : > { %v1303_v58 = vpop.f32.mrf.mxu0 }
  0xf7   : > { %v545_v60 = vmax.f32 %v543_v57, 0.0 }
  0xf8   : > { %v539_v61 = vpop.f32.mrf.mxu0 }
  0xf9   : > { %549 = vst [vmem:[#allocation2 + $0x1] sm:$0xff] %v545_v60  ;;  %v544_v62 = vadd.f32 %v539_v61, %v459_v59 }
  0xfa   : > { %v1304_v63 = vpop.f32.mrf.mxu0 }
  0xfb   : > { %v546_v0 = vmax.f32 %v544_v62, 0.0 }
  0xfd   : > { %550 = vst [vmem:[#allocation2 + $0x9] sm:$0xff] %v546_v0  ;;  %v670_v3 = vpack.c.bf16 %v546_v0, %v545_v60 }
  0xff   : > { %1342 = vmatmul.mubr.bf16.vlgmr.msra.gmra.mxu0 %v670_v3 }
 0x100   : > { %1366 = vmatpush3.bf16.msra.mxu0 %v1458_v2  ;;  %1373 = vmatprep.mubr.msk.bf16.mxu0 %vm1529_vm0, %v1528_v1  ;;  %v558_v6 = vld [vmem:[#allocation2] sm:$0xff] }
 0x101   : > { %1367 = vmatprep.subr.bf16.mxu0 %v1528_v1 }
 0x104   : > { %v559_v7 = vld [vmem:[#allocation2 + $0x8] sm:$0xff]  ;;  %1368 = vmatpush3.bf16.msra.mxu0 %v1460_v4 }
 0x105   : > { %v560_v9 = vpack.c.bf16 %v559_v7, %v558_v6  ;;  %1369 = vmatprep.subr.bf16.mxu0 %v1528_v1  ;;  %v779_v18 = vld [vmem:[#allocation2 + $0x2] sm:$0xff]  ;;  %v780_v19 = vld [vmem:[#allocation2 + $0xa] sm:$0xff] }
 0x106   : > { %v781_v20 = vpack.c.bf16 %v780_v19, %v779_v18 }
 0x107   : > { %1322 = vmatmul.mubr.bf16.vlgmr.msra.gmra.mxu1 %v560_v9 }
 0x108   : > { %1346 = vmatpush3.bf16.msra.mxu1 %v1454_v5  ;;  %1370 = vmatpush3.bf16.msra.mxu0 %v1462_v8 }
 0x109   : > { %1347 = vmatprep.subr.bf16.mxu1 %v1528_v1  ;;  %1371 = vmatprep.subr.bf16.mxu0 %v1528_v1 }
 0x10a   : > { %1361 = vmatprep.mubr.msk.bf16.mxu1 %vm1529_vm0, %v1528_v1 }
 0x10c   : > { %1348 = vmatpush3.bf16.msra.mxu1 %v1455_v10  ;;  %1372 = vmatpush3.bf16.msra.mxu0 %v1464_v11 }
 0x10d   : > { %1349 = vmatprep.subr.bf16.mxu1 %v1528_v1  ;;  %1377 = vmatprep.subr.mxu0 %v1528_v1 }
 0x10f   : > { %1374 = vmatmul.mubr.msk.bf16.vlgmr.msra.gmra.mxu0 %vm321_vm1, %v1671_v24 }
 0x110   : > { %1350 = vmatpush3.bf16.msra.mxu1 %v1456_v12  ;;  %1381 = vmatprep.mubr.msk.f32.mxu0 %vm1529_vm0, %v1528_v1 }
 0x111   : > { %1351 = vmatprep.subr.bf16.mxu1 %v1528_v1 }
 0x114   : > { %1352 = vmatpush3.bf16.msra.mxu1 %v1457_v13 }
 0x115   : > { %1353 = vmatprep.subr.bf16.mxu1 %v1528_v1 }
 0x118   : > { %1354 = vmatpush3.bf16.msra.mxu1 %v1459_v14 }
 0x119   : > { %1355 = vmatprep.subr.bf16.mxu1 %v1528_v1 }
 0x11c   : > { %1356 = vmatpush3.bf16.msra.mxu1 %v1461_v15 }
 0x11d   : > { %1357 = vmatprep.subr.bf16.mxu1 %v1528_v1 }
 0x120   : > { %1358 = vmatpush3.bf16.msra.mxu1 %v1463_v16 }
 0x121   : > { %1359 = vmatprep.subr.bf16.mxu1 %v1528_v1 }
 0x124   : > { %1360 = vmatpush3.bf16.msra.mxu1 %v1465_v17 }
 0x127   : > { %1362 = vmatmul.mubr.bf16.vlgmr.msra.gmra.mxu1 %v781_v20 }
 0x1bf   : > { %v770_v21 = vpop.f32.mrf.mxu0 }
 0x1c1   : > { %v1343_v22 = vpop.f32.mrf.mxu0 }
 0x1c3   : > { %v773_v23 = vpop.f32.mrf.mxu0 }
 0x1c5   : > { %v1344_v24 = vpop.f32.mrf.mxu0 }
 0x1c7   : > { %v659_v25 = vpop.f32.mrf.mxu1 }
 0x1c8   : > { %v666_v34 = vadd.f32 %v1152_v33, %v659_v25 }
 0x1c9   : > { %v1323_v26 = vpop.f32.mrf.mxu1 }
 0x1ca   : > { %v777_v38 = vadd.f32 %v770_v21, %v666_v34 }
 0x1cb   : > { %v662_v27 = vpop.f32.mrf.mxu1 }
 0x1cc   : > { %v667_v35 = vadd.f32 %v1152_v33, %v662_v27 }
 0x1cd   : > { %v1324_v28 = vpop.f32.mrf.mxu1 }
 0x1ce   : > { %v778_v39 = vadd.f32 %v773_v23, %v667_v35 }
 0x1cf   : > { %v956_v29 = vpop.f32.mrf.mxu0 }
 0x1d1   : > { %v1375_v30 = vpop.f32.mrf.mxu0 }
 0x1d3   : > { %v959_v31 = vpop.f32.mrf.mxu0 }
 0x1d5   : > { %v1376_v32 = vpop.f32.mrf.mxu0 }
 0x1e7   : > { %v881_v36 = vpop.f32.mrf.mxu1 }
 0x1e8   : > { %v888_v41 = vadd.f32 %v881_v36, %v777_v38 }
 0x1e9   : > { %v1363_v37 = vpop.f32.mrf.mxu1 }
 0x1ea   : > { %v963_v45 = vadd.f32 %v956_v29, %v888_v41 }
 0x1eb   : > { %v884_v40 = vpop.f32.mrf.mxu1 }
 0x1ec   : > { %v889_v42 = vadd.f32 %v884_v40, %v778_v39 }
 0x1ed   : > { %v1364_v43 = vpop.f32.mrf.mxu1 }
 0x1ee   : > { %v964_v44 = vadd.f32 %v959_v31, %v889_v42 }
 0x1f0   : > { %1378 = vmatpush3.msra.mxu0 %v964_v44 }
 0x1f1   : > { %1379 = vmatprep.subr.mxu0 %v1528_v1 }
 0x1f2   : > { %1380 = vmatpush3.msra.mxu0 %v963_v45 }
 0x1f3   : > { %1382 = vmatmul.mubr.msk.f32.vlgmr.msra.gmra.mxu0 %vm966_vm4, %v965_v46 }
 0x2b3   : > { %v1036_v47 = vpop.f32.mrf.mxu0 }
 0x2b4   : > { %1040 = vst.msk [vmem:[%s271_s23] sm:$0xff] %vm321_vm1, %v1036_v47 }
 0x2b5   : > { %v1383_v1 = vpop.f32.mrf.mxu0 }
 0x2b6   : > { %1479 = shalt.err (!%p1476_p3)
}
 0x2b7   : > { %s1480_s18 = scalar_lea.hbm %s1826_s13, 128  ;;  %s1484_s21 = scalar_lea.hbm %s1875_s7, 256 }
 0x2b8   : > { %p1481_p4 = scmp.ne.s32.totalorder %s1826_s13, %s1480_s18  ;;  %p1485_p9 = scmp.lt.s32.totalorder %s1826_s13, %s1875_s7 }
 0x2b9   : > { %p1486_p10 = scmp.lt.s32.totalorder %s1484_s21, %s1480_s18 }
 0x2ba   : > { %p1482_p7 = pnand %p1481_p4, %p1609_p5 }
 0x2bb   : > { %p1487_p11 = por %p1486_p10, %p1485_p9 }
 0x2bc   : > { %p1483_p8 = pneg %p1482_p7 }
 0x2be   : > { %p1488_p12 = pnand %p1487_p11, %p1483_p8 }
 0x2c0   : > { %1491 = shalt.err (!%p1488_p12)
}
 0x2c1   : > { %1385 = dma.vmem_to_hbm [thread:$0]  (%p1609_p5), %s1828_s29, 128, %s1826_s13, %s1042_s14  }
 0x2c2 PF: > { %p1391_p13 = scmp.ge.s32.totalorder %s1526_s27, 2  ;;  %s1067_s8 = sand.u32 1, %s1514_s24  }
 0x2c3   : > { %s1068_s9 = scalar_lea.sflag [#allocation4], %s1067_s8 }
 0x2c4   : > { %p1388_p0 = pnand %p1391_p13, %p1613_p6 }
 0x2c6   : > { %p1389_p1 = pneg %p1388_p0 }
 0x2c8   : > { %1509 = dma.done.wait (%p1389_p1), %s1068_s9, 128  }
 0x2c9   : > { %1511 = vsyncadd (%p1389_p1), %s1068_s9, 4294967168  ;;  %p17_p2 = scmp.ge.s32.totalorder %s1596_s30, 4   ;;  %s1878_s24 = smov %s1518_s25 }
 0x2ca   : > { %s1879_s25 = smov %s1522_s26  ;;  %s1880_s26 = smov %s1607_s10 }
 0x2cb   : > { %s1881_s27 = smov %s1596_s30  ;;  %19 = sbr.rel (!%p17_p2) target bundleno = 3 (0x3), region = 87 }
 0x2d0   :  { %1073 = vsyncpa [#allocation4], 1 }
 0x2d1   :  { %1075 = vsyncpa [#allocation4 + $0x1], 1 }

</bundles_post_ra>
